<compile_context>
chip_gen: v7x
topology: tpu7x:2x2x1
jax: 0.10.0
libtpu: 0.0.40
codegen_flags: <defaults>
</compile_context>

<pallas_src>
import functools

import jax
import jax.numpy as jnp
from jax import lax
from jax.experimental import pallas as pl
from jax.experimental.pallas import tpu as pltpu


def _online_loss_kernel(split_ref, x_ref, t_ref, sum_ref, cnt_ref,
                        sum_acc, cnt_acc,
                        *, hw, n_classes, ignore_index, tile_hw, need_mask):
    n = pl.program_id(0)          # batch element
    j = pl.program_id(1)          # pixel tile within the flattened H*W plane
    n_j = pl.num_programs(1)

    @pl.when(j == 0)
    def _():
        sum_acc[...] = jnp.zeros_like(sum_acc)
        cnt_acc[...] = jnp.zeros_like(cnt_acc)

    x = x_ref[...].astype(jnp.float32)            # (C, TILE) logits
    m = jnp.max(x, axis=0, keepdims=True)         # (1, TILE)
    e = jnp.exp(x - m)
    s = jnp.sum(e, axis=0, keepdims=True)         # (1, TILE) = sum exp(x - m)
    log_s = jnp.log(s)

    if need_mask:                                  # static: ragged last tile
        pos = j * tile_hw + lax.broadcasted_iota(jnp.int32, (1, tile_hw), 1)
        in_bounds = pos < hw
    else:
        in_bounds = None

    use_pseudo = n < split_ref[0]                  # scalar per grid step

    @pl.when(use_pseudo)
    def _():
        # target = argmax(softmax)  =>  x[target] == m  =>  nll = lse - m = log(s)
        # pixel kept iff max-prob > 0.9  <=>  1/s > 0.9  <=>  s < 1/0.9
        valid = s < jnp.float32(1.0 / 0.9)
        if in_bounds is not None:
            valid = jnp.logical_and(valid, in_bounds)
        sum_acc[...] += jnp.where(valid, log_s, 0.0)
        cnt_acc[...] += jnp.where(valid, 1.0, 0.0)

    @pl.when(jnp.logical_not(use_pseudo))
    def _():
        t = t_ref[...]                             # (1, TILE) int32 labels
        valid = t != ignore_index
        if in_bounds is not None:
            valid = jnp.logical_and(valid, in_bounds)
        c_iota = lax.broadcasted_iota(jnp.int32, (n_classes, tile_hw), 0)
        x_t = jnp.sum(jnp.where(c_iota == t, x, 0.0), axis=0, keepdims=True)
        nll = (m + log_s) - x_t                    # lse - x[target]
        sum_acc[...] += jnp.where(valid, nll, 0.0)
        cnt_acc[...] += jnp.where(valid, 1.0, 0.0)

    @pl.when(j == n_j - 1)
    def _():
        # single cross-lane reduction per batch element
        sum_ref[...] = jnp.sum(sum_acc[...], axis=1, keepdims=True)
        cnt_ref[...] = jnp.sum(cnt_acc[...], axis=1, keepdims=True)


def online_loss(inputs, targets, split_index=None, ignore_index=255,
                max_tile_hw=8192, max_block_bytes=8 << 20):
    """inputs: (N, C, H, W) float logits; targets: (N, H, W) int labels."""
    N, C, H, W = inputs.shape
    HW = H * W
    if split_index is None:
        split_index = N                # targets[:None] replaces the whole tensor
    elif split_index < 0:
        split_index = max(N + split_index, 0)
    # The pseudo branch assumes ignore_index is never a legal class id
    # (true for 255 with C < 256, and for the -100 default).
    assert ignore_index < 0 or ignore_index >= C

    # Pick the biggest pixel tile (multiple of 128) that keeps the
    # double-buffered (C, tile) logits block comfortably inside VMEM.
    itemsize = jnp.dtype(inputs.dtype).itemsize
    vmem_cap = max(128, (max_block_bytes // (2 * C * itemsize)) // 128 * 128)
    tile_hw = min(max_tile_hw, pl.cdiv(HW, 128) * 128, vmem_cap)
    n_tiles = pl.cdiv(HW, tile_hw)
    need_mask = (n_tiles * tile_hw != HW)   # ragged last tile -> mask in-kernel

    x = inputs.reshape(N, C, HW)            # free reshape, no transpose, no pad
    t = targets.reshape(N, 1, HW).astype(jnp.int32)

    kernel = functools.partial(
        _online_loss_kernel, hw=HW, n_classes=C,
        ignore_index=ignore_index, tile_hw=tile_hw, need_mask=need_mask)

    sums, cnts = pl.pallas_call(
        kernel,
        out_shape=(jax.ShapeDtypeStruct((N, 1, 1), jnp.float32),
                   jax.ShapeDtypeStruct((N, 1, 1), jnp.float32)),
        grid_spec=pltpu.PrefetchScalarGridSpec(
            num_scalar_prefetch=1,
            grid=(N, n_tiles),
            in_specs=[
                pl.BlockSpec((None, C, tile_hw), lambda n, j, s: (n, 0, j)),
                pl.BlockSpec((None, 1, tile_hw), lambda n, j, s: (n, 0, j)),
            ],
            out_specs=(
                pl.BlockSpec((None, 1, 1), lambda n, j, s: (n, 0, 0)),
                pl.BlockSpec((None, 1, 1), lambda n, j, s: (n, 0, 0)),
            ),
            scratch_shapes=[pltpu.VMEM((1, tile_hw), jnp.float32),
                            pltpu.VMEM((1, tile_hw), jnp.float32)]),
        compiler_params=pltpu.CompilerParams(
            dimension_semantics=("parallel", "arbitrary")),
    )(jnp.array([split_index], dtype=jnp.int32), x, t)

    total_loss = jnp.sum(sums) / jnp.sum(cnts)   # mean over non-ignored pixels
    stats = {"loss": total_loss}
    return total_loss, stats


def online_loss_ref(inputs, targets, split_index, ignore_index=255):
    """Pure-JAX reference mirroring the PyTorch forward."""
    outputs = jax.nn.softmax(inputs, axis=1)
    pseudo = jnp.argmax(outputs, axis=1)
    conf = jnp.max(outputs, axis=1)
    pseudo = jnp.where(conf <= 0.9, 255, pseudo)
    batch_idx = jnp.arange(inputs.shape[0])[:, None, None]
    tgt = jnp.where(batch_idx < split_index, pseudo, targets)
    logp = jax.nn.log_softmax(inputs, axis=1)
    valid = tgt != ignore_index
    tgt_c = jnp.clip(tgt, 0, inputs.shape[1] - 1)
    nll = -jnp.take_along_axis(logp, tgt_c[:, None], axis=1)[:, 0]
    return jnp.sum(jnp.where(valid, nll, 0.0)) / jnp.sum(valid)


def _check(loss, ref):
    loss = float(jax.block_until_ready(loss))
    ref = float(ref)
    assert abs(loss - ref) < 1e-4 * max(1.0, abs(ref)), (loss, ref)


if __name__ == "__main__":
    key = jax.random.PRNGKey(0)

    # --- test 1: mixed pseudo/labeled, single exact tile (HW = 256) ---------
    k1, k2 = jax.random.split(key)
    N, C, H, W = 2, 4, 16, 16
    inputs = jax.random.normal(k1, (N, C, H, W), dtype=jnp.float32) * 3.0
    targets = jax.random.randint(k2, (N, H, W), 0, C).astype(jnp.int32)
    targets = targets.at[1, :2, :].set(255)  # ignored pixels in labeled half
    split_index = 1

    loss, stats = online_loss(inputs, targets, split_index=split_index)
    _check(loss, online_loss_ref(inputs, targets, split_index))
    assert "loss" in stats

    # --- test 2: all-pseudo, odd spatial size (ragged-tile masking path) ----
    k3, k4 = jax.random.split(k1)
    N2, C2, H2, W2 = 2, 5, 10, 13
    inputs2 = jax.random.normal(k3, (N2, C2, H2, W2), dtype=jnp.float32) * 3.0
    targets2 = jax.random.randint(k4, (N2, H2, W2), 0, C2).astype(jnp.int32)
    split2 = 2

    loss2, _ = online_loss(inputs2, targets2, split_index=split2)
    _check(loss2, online_loss_ref(inputs2, targets2, split2))

    # --- test 3: multi-tile accumulation (force tile=128 on test-1 data) ----
    loss3, _ = online_loss(inputs, targets, split_index=split_index,
                           max_tile_hw=128)
    _check(loss3, online_loss_ref(inputs, targets, split_index))

    # --- test 4: multi-tile + ragged last tile (test-2 data, tile=128) ------
    loss4, _ = online_loss(inputs2, targets2, split_index=1, max_tile_hw=128)
    _check(loss4, online_loss_ref(inputs2, targets2, 1))

    print("KERNEL_OK")
</pallas_src>

<mosaic_0001>
module attributes {stable_mosaic.version = 11 : i64} {
  func.func @_online_loss_kernel(%arg0: i32, %arg1: i32, %arg2: memref<1xi32, #tpu.memory_space<smem>>, %arg3: memref<1x4x256xf32, #tpu.memory_space<vmem>>, %arg4: memref<1x1x256xi32, #tpu.memory_space<vmem>>, %arg5: memref<1x1x1xf32, #tpu.memory_space<vmem>>, %arg6: memref<1x1x1xf32, #tpu.memory_space<vmem>>, %arg7: memref<1x256xf32, #tpu.memory_space<vmem>>, %arg8: memref<1x256xf32, #tpu.memory_space<vmem>>) attributes {dimension_semantics = [#tpu.dimension_semantics<parallel>, #tpu.dimension_semantics<arbitrary>], iteration_bounds = array<i64: 2, 1>, scalar_prefetch = 1 : i64, scratch_operands = 2 : i64, tpu.core_type = #tpu.core_type<tc>, window_params = [{transform_indices = @transform_0, window_bounds = array<i64: 1, 4, 256>}, {transform_indices = @transform_1, window_bounds = array<i64: 1, 1, 256>}, {transform_indices = @transform_2, window_bounds = array<i64: 1, 1, 1>}, {transform_indices = @transform_3, window_bounds = array<i64: 1, 1, 1>}]} {
    %c0_i32 = arith.constant 0 : i32
    %0 = arith.cmpi eq, %arg1, %c0_i32 : i32
    %1 = arith.extui %0 : i1 to i32
    %c0_i32_0 = arith.constant 0 : i32
    %2 = arith.cmpi ne, %1, %c0_i32_0 : i32
    scf.if %2 {
      %cst_9 = arith.constant 0.000000e+00 : f32
      %23 = vector.broadcast %cst_9 : f32 to vector<1x256xf32>
      %c0_10 = arith.constant 0 : index
      %c0_11 = arith.constant 0 : index
      %24 = vector.load %arg7[%c0_10, %c0_11] : memref<1x256xf32, #tpu.memory_space<vmem>>, vector<1x256xf32>
      tpu.vector_store %arg7[%c0_10, %c0_11], %23 {strides = array<i32>} : memref<1x256xf32, #tpu.memory_space<vmem>>, vector<1x256xf32>,
      %cst_12 = arith.constant 0.000000e+00 : f32
      %25 = vector.broadcast %cst_12 : f32 to vector<1x256xf32>
      %c0_13 = arith.constant 0 : index
      %c0_14 = arith.constant 0 : index
      %26 = vector.load %arg8[%c0_13, %c0_14] : memref<1x256xf32, #tpu.memory_space<vmem>>, vector<1x256xf32>
      tpu.vector_store %arg8[%c0_13, %c0_14], %25 {strides = array<i32>} : memref<1x256xf32, #tpu.memory_space<vmem>>, vector<1x256xf32>,
    } else {
    }
    %c0 = arith.constant 0 : index
    %c0_1 = arith.constant 0 : index
    %c0_2 = arith.constant 0 : index
    %3 = vector.load %arg3[%c0, %c0_1, %c0_2] : memref<1x4x256xf32, #tpu.memory_space<vmem>>, vector<1x4x256xf32>
    %4 = vector.shape_cast %3 : vector<1x4x256xf32> to vector<4x256xf32>
    %cst = arith.constant dense<0xFF800000> : vector<256xf32>
    %5 = vector.multi_reduction <maximumf>, %4, %cst [0] : vector<4x256xf32> to vector<256xf32>
    %6 = vector.shape_cast %5 : vector<256xf32> to vector<1x256xf32>
    %7 = vector.broadcast %6 : vector<1x256xf32> to vector<4x256xf32>
    %8 = arith.subf %4, %7 : vector<4x256xf32>
    %9 = math.exp %8 : vector<4x256xf32>
    %cst_3 = arith.constant dense<0.000000e+00> : vector<256xf32>
    %10 = vector.multi_reduction <add>, %9, %cst_3 [0] : vector<4x256xf32> to vector<256xf32>
    %11 = vector.shape_cast %10 : vector<256xf32> to vector<1x256xf32>
    %12 = math.log %11 : vector<1x256xf32>
    %c0_4 = arith.constant 0 : index
    %13 = memref.load %arg2[%c0_4] : memref<1xi32, #tpu.memory_space<smem>>
    %14 = arith.cmpi slt, %arg0, %13 : i32
    %15 = arith.extui %14 : i1 to i32
    %c0_i32_5 = arith.constant 0 : i32
    %16 = arith.cmpi ne, %15, %c0_i32_5 : i32
    scf.if %16 {
      %cst_9 = arith.constant 1.11111116 : f32
      %23 = vector.broadcast %cst_9 : f32 to vector<1x256xf32>
      %24 = arith.cmpf olt, %11, %23 : vector<1x256xf32>
      %c0_10 = arith.constant 0 : index
      %c0_11 = arith.constant 0 : index
      %25 = vector.load %arg7[%c0_10, %c0_11] : memref<1x256xf32, #tpu.memory_space<vmem>>, vector<1x256xf32>
      %cst_12 = arith.constant 0.000000e+00 : f32
      %26 = vector.broadcast %cst_12 : f32 to vector<1x256xf32>
      %27 = arith.select %24, %12, %26 : vector<1x256xi1>, vector<1x256xf32>
      %28 = arith.addf %25, %27 : vector<1x256xf32>
      %c0_13 = arith.constant 0 : index
      %c0_14 = arith.constant 0 : index
      %29 = vector.load %arg7[%c0_13, %c0_14] : memref<1x256xf32, #tpu.memory_space<vmem>>, vector<1x256xf32>
      tpu.vector_store %arg7[%c0_13, %c0_14], %28 {strides = array<i32>} : memref<1x256xf32, #tpu.memory_space<vmem>>, vector<1x256xf32>,
      %c0_15 = arith.constant 0 : index
      %c0_16 = arith.constant 0 : index
      %30 = vector.load %arg8[%c0_15, %c0_16] : memref<1x256xf32, #tpu.memory_space<vmem>>, vector<1x256xf32>
      %cst_17 = arith.constant 1.000000e+00 : f32
      %cst_18 = arith.constant 0.000000e+00 : f32
      %31 = vector.broadcast %cst_17 : f32 to vector<1x256xf32>
      %32 = vector.broadcast %cst_18 : f32 to vector<1x256xf32>
      %33 = arith.select %24, %31, %32 : vector<1x256xi1>, vector<1x256xf32>
      %34 = arith.addf %30, %33 : vector<1x256xf32>
      %c0_19 = arith.constant 0 : index
      %c0_20 = arith.constant 0 : index
      %35 = vector.load %arg8[%c0_19, %c0_20] : memref<1x256xf32, #tpu.memory_space<vmem>>, vector<1x256xf32>
      tpu.vector_store %arg8[%c0_19, %c0_20], %34 {strides = array<i32>} : memref<1x256xf32, #tpu.memory_space<vmem>>, vector<1x256xf32>,
    } else {
    }
    %true = arith.constant true
    %17 = arith.xori %14, %true : i1
    %18 = arith.extui %17 : i1 to i32
    %c0_i32_6 = arith.constant 0 : i32
    %19 = arith.cmpi ne, %18, %c0_i32_6 : i32
    scf.if %19 {
      %c0_9 = arith.constant 0 : index
      %c0_10 = arith.constant 0 : index
      %c0_11 = arith.constant 0 : index
      %23 = vector.load %arg4[%c0_9, %c0_10, %c0_11] : memref<1x1x256xi32, #tpu.memory_space<vmem>>, vector<1x1x256xi32>
      %24 = vector.shape_cast %23 : vector<1x1x256xi32> to vector<1x256xi32>
      %c255_i32 = arith.constant 255 : i32
      %25 = vector.broadcast %c255_i32 : i32 to vector<1x256xi32>
      %26 = arith.cmpi ne, %24, %25 : vector<1x256xi32>
      %27 = tpu.iota {dimensions = array<i32: 0>} : vector<4x256xi32>
      %28 = vector.broadcast %24 : vector<1x256xi32> to vector<4x256xi32>
      %29 = arith.cmpi eq, %27, %28 : vector<4x256xi32>
      %cst_12 = arith.constant 0.000000e+00 : f32
      %30 = vector.broadcast %cst_12 : f32 to vector<4x256xf32>
      %31 = arith.select %29, %4, %30 : vector<4x256xi1>, vector<4x256xf32>
      %cst_13 = arith.constant dense<0.000000e+00> : vector<256xf32>
      %32 = vector.multi_reduction <add>, %31, %cst_13 [0] : vector<4x256xf32> to vector<256xf32>
      %33 = vector.shape_cast %32 : vector<256xf32> to vector<1x256xf32>
      %34 = arith.addf %6, %12 : vector<1x256xf32>
      %35 = arith.subf %34, %33 : vector<1x256xf32>
      %c0_14 = arith.constant 0 : index
      %c0_15 = arith.constant 0 : index
      %36 = vector.load %arg7[%c0_14, %c0_15] : memref<1x256xf32, #tpu.memory_space<vmem>>, vector<1x256xf32>
      %cst_16 = arith.constant 0.000000e+00 : f32
      %37 = vector.broadcast %cst_16 : f32 to vector<1x256xf32>
      %38 = arith.select %26, %35, %37 : vector<1x256xi1>, vector<1x256xf32>
      %39 = arith.addf %36, %38 : vector<1x256xf32>
      %c0_17 = arith.constant 0 : index
      %c0_18 = arith.constant 0 : index
      %40 = vector.load %arg7[%c0_17, %c0_18] : memref<1x256xf32, #tpu.memory_space<vmem>>, vector<1x256xf32>
      tpu.vector_store %arg7[%c0_17, %c0_18], %39 {strides = array<i32>} : memref<1x256xf32, #tpu.memory_space<vmem>>, vector<1x256xf32>,
      %c0_19 = arith.constant 0 : index
      %c0_20 = arith.constant 0 : index
      %41 = vector.load %arg8[%c0_19, %c0_20] : memref<1x256xf32, #tpu.memory_space<vmem>>, vector<1x256xf32>
      %cst_21 = arith.constant 1.000000e+00 : f32
      %cst_22 = arith.constant 0.000000e+00 : f32
      %42 = vector.broadcast %cst_21 : f32 to vector<1x256xf32>
      %43 = vector.broadcast %cst_22 : f32 to vector<1x256xf32>
      %44 = arith.select %26, %42, %43 : vector<1x256xi1>, vector<1x256xf32>
      %45 = arith.addf %41, %44 : vector<1x256xf32>
      %c0_23 = arith.constant 0 : index
      %c0_24 = arith.constant 0 : index
      %46 = vector.load %arg8[%c0_23, %c0_24] : memref<1x256xf32, #tpu.memory_space<vmem>>, vector<1x256xf32>
      tpu.vector_store %arg8[%c0_23, %c0_24], %45 {strides = array<i32>} : memref<1x256xf32, #tpu.memory_space<vmem>>, vector<1x256xf32>,
    } else {
    }
    %c0_i32_7 = arith.constant 0 : i32
    %20 = arith.cmpi eq, %arg1, %c0_i32_7 : i32
    %21 = arith.extui %20 : i1 to i32
    %c0_i32_8 = arith.constant 0 : i32
    %22 = arith.cmpi ne, %21, %c0_i32_8 : i32
    scf.if %22 {
      %c0_9 = arith.constant 0 : index
      %c0_10 = arith.constant 0 : index
      %23 = vector.load %arg7[%c0_9, %c0_10] : memref<1x256xf32, #tpu.memory_space<vmem>>, vector<1x256xf32>
      %cst_11 = arith.constant dense<0.000000e+00> : vector<1xf32>
      %24 = vector.multi_reduction <add>, %23, %cst_11 [1] : vector<1x256xf32> to vector<1xf32>
      %25 = vector.shape_cast %24 : vector<1xf32> to vector<1x1xf32>
      %c0_12 = arith.constant 0 : index
      %c0_13 = arith.constant 0 : index
      %c0_14 = arith.constant 0 : index
      %26 = vector.load %arg5[%c0_12, %c0_13, %c0_14] : memref<1x1x1xf32, #tpu.memory_space<vmem>>, vector<1x1x1xf32>
      %27 = vector.shape_cast %26 : vector<1x1x1xf32> to vector<1x1xf32>
      %28 = vector.shape_cast %25 : vector<1x1xf32> to vector<1x1x1xf32>
      tpu.vector_store %arg5[%c0_12, %c0_13, %c0_14], %28 {strides = array<i32>} : memref<1x1x1xf32, #tpu.memory_space<vmem>>, vector<1x1x1xf32>,
      %c0_15 = arith.constant 0 : index
      %c0_16 = arith.constant 0 : index
      %29 = vector.load %arg8[%c0_15, %c0_16] : memref<1x256xf32, #tpu.memory_space<vmem>>, vector<1x256xf32>
      %cst_17 = arith.constant dense<0.000000e+00> : vector<1xf32>
      %30 = vector.multi_reduction <add>, %29, %cst_17 [1] : vector<1x256xf32> to vector<1xf32>
      %31 = vector.shape_cast %30 : vector<1xf32> to vector<1x1xf32>
      %c0_18 = arith.constant 0 : index
      %c0_19 = arith.constant 0 : index
      %c0_20 = arith.constant 0 : index
      %32 = vector.load %arg6[%c0_18, %c0_19, %c0_20] : memref<1x1x1xf32, #tpu.memory_space<vmem>>, vector<1x1x1xf32>
      %33 = vector.shape_cast %32 : vector<1x1x1xf32> to vector<1x1xf32>
      %34 = vector.shape_cast %31 : vector<1x1xf32> to vector<1x1x1xf32>
      tpu.vector_store %arg6[%c0_18, %c0_19, %c0_20], %34 {strides = array<i32>} : memref<1x1x1xf32, #tpu.memory_space<vmem>>, vector<1x1x1xf32>,
    } else {
    }
    return
  }
  func.func @transform_0(%arg0: i32, %arg1: i32, %arg2: memref<1xi32, #tpu.memory_space<smem>>) -> (i32, i32, i32) {
    %c0_i32 = arith.constant 0 : i32
    %c0_i32_0 = arith.constant 0 : i32
    return %arg0, %c0_i32, %arg1 : i32, i32, i32
  }
  func.func @transform_1(%arg0: i32, %arg1: i32, %arg2: memref<1xi32, #tpu.memory_space<smem>>) -> (i32, i32, i32) {
    %c0_i32 = arith.constant 0 : i32
    %c0_i32_0 = arith.constant 0 : i32
    return %arg0, %c0_i32, %arg1 : i32, i32, i32
  }
  func.func @transform_2(%arg0: i32, %arg1: i32, %arg2: memref<1xi32, #tpu.memory_space<smem>>) -> (i32, i32, i32) {
    %c0_i32 = arith.constant 0 : i32
    %c0_i32_0 = arith.constant 0 : i32
    %c0_i32_1 = arith.constant 0 : i32
    return %arg0, %c0_i32, %c0_i32_0 : i32, i32, i32
  }
  func.func @transform_3(%arg0: i32, %arg1: i32, %arg2: memref<1xi32, #tpu.memory_space<smem>>) -> (i32, i32, i32) {
    %c0_i32 = arith.constant 0 : i32
    %c0_i32_0 = arith.constant 0 : i32
    %c0_i32_1 = arith.constant 0 : i32
    return %arg0, %c0_i32, %c0_i32_0 : i32, i32, i32
  }
}

</mosaic_0001>

<bundles_post_ra>
// kernel: tpu_custom_call.1
= control target key start
LH: loop header
LB: loop body
LE: loop exit
PB: predicated region body
PF: predicated region fallthrough
CT: control target
= control target key end

     0   :  { %s979_s0 = inlined_call_operand.<no memory space> [shape: s32[1], index: 0, kind: input, shape index: {}]   ;;  %s980_s1 = inlined_call_operand.hbm [shape: f32[2,4,256], index: 1, kind: input, shape index: {}]   ;;  %s981_s2 = inlined_call_operand.vmem [shape: s32[2,1,256], index: 2, kind: input, shape index: {}]   ;;  %s982_s3 = inlined_call_operand.vmem [shape: f32[2,1,1], index: 3, kind: output, shape index: {0}]   ;;  %s983_s4 = inlined_call_operand.vmem [shape: f32[2,1,1], index: 4, kind: output, shape index: {1}]  }
   0x1   :  { %10 = sst [smem:[#allocation5]] %s979_s0 }
   0x2   :  { %11 = vsyncpa [#allocation7], 0 }
   0x3   :  { %13 = vsyncpa [#allocation7 + $0x1], 0  ;;  %s777_s17 = smov 0   ;;  %s779_s18 = smov 0  }
   0x4   :  { %s781_s19 = smov 0   ;;  %s783_s20 = smov 0  }
   0x5   :  { %s785_s21 = smov 0   ;;  %s787_s22 = smov 0  }
   0x6 LB: > { %s579_s0 = sadd.s32 4294967295, %s741_s22   ;;  %s31_s23 = sadd.s32 1, %s737_s21  ;;  %s741_s22 = sphi %s787_s22, %s19_s22   ;;  %s737_s21 = sphi %s785_s21, %s995_s21   ;;  %s733_s20 = sphi %s783_s20, %s994_s20   ;;  %s729_s19 = sphi %s781_s19, %s993_s19   ;;  %s725_s18 = sphi %s779_s18, %s992_s18   ;;  %s721_s17 = sphi %s777_s17, %s991_s17  }
   0x7   : > { %p33_p0 = scmp.ge.s32.totalorder %s31_s23, 2  ;;  %s40_s24 = sadd.s32 1, %s729_s19 }
   0x8   : > { %p47_p1 = scmp.ne.s32.totalorder %s729_s19, %s725_s18  ;;  %p48_p2 = scmp.eq.s32.totalorder %s741_s22, 0 }
   0x9   : > { %s997_s23 = smov (%p33_p0, %s31_s23), 0  ;;  %p53_p4 = scmp.ne.s32.totalorder %s725_s18, %s721_s17 }
   0xa   : > { %p813_p3 = por %p48_p2, %p47_p1  ;;  %s35_s26 = ssub.s32 %s737_s21, %s997_s23 }
   0xb   : > { %p54_p5 = scmp.eq.s32.totalorder %s579_s0, 0  ;;  %p38_p6 = scmp.eq.s32.totalorder %s35_s26, 0 }
   0xc   : > { %p600_p8 = scmp.lt.s32.totalorder %s741_s22, 2  ;;  %s157_s29 = sand.u32 1, %s729_s19  }
   0xd   : > { %p820_p7 = por %p54_p5, %p53_p4  ;;  %s593_s30 = sshll.u32 %s737_s21, 7 }
   0xe   : > { %s826_s28 = scalar_select %p38_p6, %s729_s19, %s40_s24  }
   0xf   : > { %s583_s5 = sshll.u32 %s157_s29, 3  ;;  %s833_s8 = scalar_lea.hbm %s980_s1, %s593_s30 }
  0x10   : > { %s161_s9 = scalar_lea.vmem [#allocation6], %s583_s5  ;;  %p837_p9 = pnand %p600_p8, %p813_p3 }
  0x11   : > { %s171_s10 = sshll.u32 %s161_s9, 4  ;;  %s158_s12 = scalar_lea.sflag [#allocation7], %s157_s29  ;;  %s841_s10 = int_to_ptr.vmem [resolvable:$true] %s171_s10 }
  0x12   : > { %s661_s13 = scalar_lea.hbm %s833_s8, 128  ;;  %p663_p13 = pneg %p837_p9 }
  0x13   : > { %p662_p12 = scmp.ne.s32.totalorder %s833_s8, %s661_s13  ;;  %s666_s16 = scalar_lea.hbm %s980_s1, 256 }
  0x14   : > { %p667_p2 = scmp.lt.u32.totalorder %s833_s8, %s980_s1  ;;  %p668_p3 = scmp.lt.u32.totalorder %s666_s16, %s661_s13 }
  0x15   : > { %p664_p0 = pnand %p663_p13, %p662_p12  ;;  %p670_p5 = scmp.lt.u32.totalorder %s661_s13, %s833_s8 }
  0x16   : > { %p669_p4 = por %p668_p3, %p667_p2 }
  0x17   : > { %p665_p1 = pneg %p664_p0 }
  0x18   : > { %p671_p6 = por %p670_p5, %p669_p4 }
  0x1a   : > { %p672_p8 = pnand %p671_p6, %p665_p1 }
  0x1c   : > { %675 = shalt.err (!%p672_p8)
}
  0x1d   : > { %s676_s24 = scalar_lea.vmem %s841_s10, 128  ;;  %s743_s25 = smov [#allocation6]  }
  0x1e   : > { %p677_p12 = scmp.ne.s32.totalorder %s841_s10, %s676_s24  ;;  %s681_s26 = sshll.u32 %s743_s25, 4  ;;  %s682_s26 = int_to_ptr.vmem [resolvable:$false] %s681_s26 }
  0x1f   : > { %s683_s29 = scalar_lea.vmem %s682_s26, 256  ;;  %p684_p11 = scmp.lt.s32.totalorder %s841_s10, %s682_s26 }
  0x20   : > { %p679_p0 = pnand %p677_p12, %p663_p13  ;;  %p685_p2 = scmp.lt.s32.totalorder %s683_s29, %s676_s24 }
  0x22   : > { %p680_p10 = pneg %p679_p0  ;;  %p686_p3 = por %p685_p2, %p684_p11 }
  0x24   : > { %p687_p4 = pnand %p686_p3, %p680_p10 }
  0x26   : > { %690 = shalt.err (!%p687_p4)
}
  0x27   : > { %599 = dma.hbm_to_vmem [thread:$0]  (!%p837_p9), %s833_s8, 128, %s841_s10, %s158_s12  }
  0x28   : > { %p987_p1 = scmp.lt.s32.totalorder %s741_s22, 3  ;;  %p988_p5 = scmp.ge.s32.totalorder %s741_s22, 1 }
  0x2a   : > { %p189_p13 = pnand %p988_p5, %p987_p1 }
  0x2b   : > { %s194_s30 = sand.u32 (!%p189_p13), 1, %s725_s18  }
  0x2c   : > { %192 = sbr.rel (%p189_p13) target bundleno = 316 (0x13c), region = 28  ;;  %s587_s5 = sshll.u32 (!%p189_p13), %s194_s30, 3 }
  0x2d   : > { %s195_s6 = scalar_lea.sflag (!%p189_p13), [#allocation7], %s194_s30  ;;  %s198_s7 = scalar_lea.vmem (!%p189_p13), [#allocation6], %s587_s5 }
  0x33   : > { %716 = dma.done.wait (%p820_p7), %s195_s6, 128  }
  0x34   : > { %718 = vsyncadd (%p820_p7), %s195_s6, 4294967168  ;;  %p232_p10 = scmp.lt.s32.totalorder %s733_s20, 1  ;;  %v250_v0 = vlaneseq  ;;  %s880_s8 = sld [smem:[#allocation5]]  ;;  %v744_v2 = vmov 0.0   ;;  %vm260_vm1 = vcmask 1043456   ;;  %v908_v3 = vld [vmem:[%s198_s7] sm:$0xff] }
  0x35   : > { %v912_v4 = vcombine.high %v908_v3, %v908_v3  ;;  %v261_v5 = vsel %vm260_vm1, %v908_v3, -inf }
  0x36   : > { %s883_s9 = scalar_select %p232_p10, %s733_s20, 1  ;;  %vm886_vm0 = vcmp.lt.s32.totalorder %v250_v0, 256  ;;  %v262_v6 = vrot.slane %v261_v5, 4 }
  0x37   : > { %254 = vst.msk [vmem:[#allocation2] sm:$0x3] %vm886_vm0, %v744_v2  ;;  %255 = vst.msk [vmem:[#allocation3] sm:$0x3] %vm886_vm0, %v744_v2  ;;  %v268_v7 = vsel %vm260_vm1, %v912_v4, -inf }
  0x38   : > { %s588_s27 = sshll.u32 %s883_s9, 1  ;;  %s242_s12 = scalar_lea.vmem %s982_s3, %s883_s9  ;;  %v263_v8 = vmax.f32 %v261_v5, %v262_v6  ;;  %v269_v9 = vrot.slane %v268_v7, 4 }
  0x39   : > { %s902_s15 = scalar_lea.vmem %s981_s2, %s588_s27  ;;  %s245_s0 = scalar_lea.vmem %s983_s4, %s883_s9 }
  0x3a   : > { %v264_v10 = vrot.slane %v263_v8, 2  ;;  %v270_v11 = vmax.f32 %v268_v7, %v269_v9  ;;  %p589_p7 = scmp.ge.s32.totalorder %s733_s20, %s880_s8 }
  0x3b   : > { %v745_v44 = vmov (!%p589_p7), 1966171168   ;;  %v320_v46 = vshrl.u32 (!%p589_p7), %v250_v0, 7  ;;  %v746_v47 = vmov (!%p589_p7), 0.0  }
  0x3c   : > { %v265_v12 = vmax.f32 %v263_v8, %v264_v10  ;;  %v271_v13 = vrot.slane %v270_v11, 2  ;;  %v317_v45 = vunpack.c.l.s4 (!%p589_p7), %v745_v44 }
  0x3e   : > { %v266_v14 = vrot.slane %v265_v12, 1  ;;  %v272_v15 = vmax.f32 %v270_v11, %v271_v13  ;;  %v318_v51 = vunpack.c.0.s8 (!%p589_p7), %v317_v45  ;;  %v310_v56 = vld [vmem:[#allocation2] sm:$0x3] (!%p589_p7)  ;;  %v337_v57 = vld [vmem:[#allocation3] sm:$0x3] (!%p589_p7) }
  0x40   : > { %v918_v16 = vmax.f32 %v265_v12, %v266_v14  ;;  %v273_v17 = vrot.slane %v272_v15, 1  ;;  %v321_v53 = vsub.s32 (!%p589_p7), %v318_v51, %v320_v46 }
  0x42   : > { %v920_v18 = vmax.f32 %v272_v15, %v273_v17 }
  0x44   : > { %v277_v19 = vcombine.low %v918_v16, %v920_v18 }
  0x46   : > { %v279_v20 = vsub.f32 %v908_v3, %v277_v19 }
  0x48   : > { %v280_v21 = vmul.f32 1.442695, %v279_v20 }
  0x4a   : > { %655 = vpow2.f32 %v280_v21 }
  0x54   : > { %v656_v22 = vpop.eup %655 }
  0x55   : > { %v283_v23 = vcombine.high %v656_v22, %v656_v22  ;;  %v285_v24 = vsel %vm260_vm1, %v656_v22, 0.0 }
  0x56   : > { %v286_v25 = vrot.slane %v285_v24, 4 }
  0x57   : > { %v292_v26 = vsel %vm260_vm1, %v283_v23, 0.0 }
  0x58   : > { %v287_v27 = vadd.f32 %v286_v25, %v285_v24  ;;  %v293_v28 = vrot.slane %v292_v26, 4 }
  0x5a   : > { %v288_v29 = vrot.slane %v287_v27, 2  ;;  %v294_v30 = vadd.f32 %v293_v28, %v292_v26 }
  0x5c   : > { %v289_v31 = vadd.f32 %v288_v29, %v287_v27  ;;  %v295_v32 = vrot.slane %v294_v30, 2 }
  0x5e   : > { %v290_v33 = vrot.slane %v289_v31, 1  ;;  %v296_v34 = vadd.f32 %v295_v32, %v294_v30 }
  0x60   : > { %v291_v35 = vadd.f32 %v290_v33, %v289_v31  ;;  %v297_v36 = vrot.slane %v296_v34, 1 }
  0x62   : > { %v298_v37 = vadd.f32 %v297_v36, %v296_v34  ;;  %657 = vlog2.f32 %v291_v35  ;;  %vm308_vm2 = vcmp.lt.f32.partialorder (!%p589_p7), %v291_v35, 1.1111112 }
  0x63   : > { %v338_v48 = vsel (!%p589_p7), %vm308_vm2, 1.0, %v746_v47 }
  0x64   : > { %659 = vlog2.f32 %v298_v37  ;;  %vm309_vm3 = vcmp.lt.f32.partialorder (!%p589_p7), %v298_v37, 1.1111112 }
  0x65   : > { %v339_v49 = vsel (!%p589_p7), %vm309_vm3, 1.0, %v746_v47 }
  0x66   : > { %v342_v52 = vcombine.low (!%p589_p7), %v338_v48, %v339_v49 }
  0x68   : > { %v349_v55 = vrot.slane (!%p589_p7), %v342_v52, %v321_v53 }
  0x69   : > { %307 = sbr.rel (%p589_p7) target bundleno = 123 (0x7b), region = 40 }
  0x6a   : > { %v356_v59 = vrot.slane (!%p589_p7), %v349_v55, %v321_v53 }
  0x6c   : > { %v658_v38 = vpop.eup %657  ;;  %v358_v61 = vadd.f32 (!%p589_p7), %v356_v59, %v337_v57 }
  0x6d   : > { %v300_v39 = vmul.f32 0.6931472, %v658_v38 }
  0x6e   : > { %v660_v40 = vpop.eup %659  ;;  %359 = vst.msk [vmem:[#allocation3] sm:$0x3] (!%p589_p7), %vm886_vm0, %v358_v61 }
  0x6f   : > { %v302_v41 = vmul.f32 0.6931472, %v660_v40  ;;  %v311_v42 = vsel (!%p589_p7), %vm308_vm2, %v300_v39, 0.0 }
  0x71   : > { %v312_v43 = vsel %vm309_vm3, %v302_v41, 0.0 }
  0x72   : > { %v315_v50 = vcombine.low %v311_v42, %v312_v43 }
  0x74   : > { %v322_v54 = vrot.slane %v315_v50, %v321_v53 }
  0x76   : > { %v329_v58 = vrot.slane %v322_v54, %v321_v53 }
  0x78   : > { %v331_v60 = vadd.f32 %v329_v58, %v310_v56 }
  0x7a   : > { %336 = vst.msk [vmem:[#allocation2] sm:$0x3] %vm886_vm0, %v331_v60 }
  0x7b PF: > { %p590_p9 = scmp.lt.s32.totalorder %s733_s20, %s880_s8 }
  0x7c   : > { %v364_v62 = vld [vmem:[%s902_s15] sm:$0x3] (!%p590_p9)  ;;  %v367_v63 = vshrl.u32 (!%p590_p9), %v250_v0, 7  ;;  %v747_v7 = vmov (!%p590_p9), 0.0   ;;  %v748_v24 = vmov (!%p590_p9), 1966171168   ;;  %v394_v28 = vadd.f32 (!%p590_p9), %v300_v39, %v918_v16 }
  0x7d   : > { %363 = sbr.rel (%p590_p9) target bundleno = 157 (0x9d), region = 44  ;;  %vm365_vm4 = vcmp.ne.s32.totalorder (!%p590_p9), %v364_v62, 255  ;;  %v403_v25 = vunpack.c.l.s4 (!%p590_p9), %v748_v24 }
  0x7e   : > { %v370_v5 = vsub.s32 (!%p590_p9), 0, %v367_v63  ;;  %v374_v6 = vsub.s32 (!%p590_p9), 1, %v367_v63  ;;  %v425_v8 = vsel (!%p590_p9), %vm365_vm4, 1.0, %v747_v7 }
  0x7f   : > { %v404_v30 = vunpack.c.0.s8 (!%p590_p9), %v403_v25 }
  0x80   : > { %v424_v2 = vld [vmem:[#allocation3] sm:$0x3] (!%p590_p9)  ;;  %v371_v10 = vrot.slane (!%p590_p9), %v364_v62, %v370_v5  ;;  %v375_v11 = vrot.slane (!%p590_p9), %v364_v62, %v374_v6 }
  0x81   : > { %v426_v9 = vadd.f32 (!%p590_p9), %v425_v8, %v424_v2  ;;  %v407_v35 = vsub.s32 (!%p590_p9), %v404_v30, %v367_v63  ;;  %v398_v38 = vld [vmem:[#allocation2] sm:$0x3] (!%p590_p9) }
  0x82   : > { %vm376_vm5 = vcmp.eq.s32.totalorder (!%p590_p9), %v367_v63, %v371_v10  ;;  %vm377_vm6 = vcmp.eq.s32.totalorder (!%p590_p9), %v367_v63, %v375_v11 }
  0x83   : > { %427 = vst.msk [vmem:[#allocation3] sm:$0x3] (!%p590_p9), %vm886_vm0, %v426_v9  ;;  %v378_v12 = vsel (!%p590_p9), %vm376_vm5, %v908_v3, 0.0  ;;  %v379_v13 = vsel (!%p590_p9), %vm377_vm6, %v912_v4, 0.0  ;;  %v395_v4 = vadd.f32 (!%p590_p9), %v302_v41, %v920_v18 }
  0x84   : > { %v380_v14 = vsel %vm260_vm1, %v378_v12, 0.0  ;;  %v387_v15 = vsel %vm260_vm1, %v379_v13, 0.0 }
  0x85   : > { %v381_v17 = vrot.slane %v380_v14, 4  ;;  %v388_v19 = vrot.slane %v387_v15, 4 }
  0x87   : > { %v382_v20 = vadd.f32 %v381_v17, %v380_v14  ;;  %v389_v21 = vadd.f32 %v388_v19, %v387_v15 }
  0x89   : > { %v383_v22 = vrot.slane %v382_v20, 2  ;;  %v390_v23 = vrot.slane %v389_v21, 2 }
  0x8b   : > { %v384_v26 = vadd.f32 %v383_v22, %v382_v20  ;;  %v391_v27 = vadd.f32 %v390_v23, %v389_v21 }
  0x8d   : > { %v385_v29 = vrot.slane %v384_v26, 1  ;;  %v392_v3 = vrot.slane %v391_v27, 1 }
  0x8f   : > { %v386_v31 = vadd.f32 %v385_v29, %v384_v26  ;;  %v393_v32 = vadd.f32 %v392_v3, %v391_v27 }
  0x91   : > { %v396_v33 = vsub.f32 %v394_v28, %v386_v31  ;;  %v397_v34 = vsub.f32 %v395_v4, %v393_v32 }
  0x93   : > { %v401_v36 = vcombine.low %v396_v33, %v397_v34 }
  0x95   : > { %v408_v37 = vrot.slane %v401_v36, %v407_v35 }
  0x97   : > { %v415_v40 = vrot.slane %v408_v37, %v407_v35 }
  0x99   : > { %v417_v42 = vsel %vm365_vm4, %v415_v40, 0.0 }
  0x9a   : > { %v418_v43 = vadd.f32 %v417_v42, %v398_v38 }
  0x9c   : > { %423 = vst.msk [vmem:[#allocation2] sm:$0x3] %vm886_vm0, %v418_v43 }
  0x9d PF: > { %v434_v16 = vshrl.u32 %v250_v0, 7  ;;  %vm443_vm7 = vcmask 1040384   ;;  %vm449_vm8 = vcmask 0  }
  0x9f   : > { %v435_v41 = vsub.s32 0, %v434_v16  ;;  %v439_v44 = vsub.s32 1, %v434_v16 }
  0xa3   : > { %v431_v18 = vld [vmem:[#allocation2] sm:$0x3]  ;;  %v451_v39 = vld [vmem:[#allocation3] sm:$0x3] }
  0xa4   : > { %v436_v45 = vrot.slane %v431_v18, %v435_v41  ;;  %v440_v46 = vrot.slane %v431_v18, %v439_v44  ;;  %v456_v47 = vrot.slane %v451_v39, %v435_v41  ;;  %v460_v48 = vrot.slane %v451_v39, %v439_v44 }
  0xa6   : > { %v444_v49 = vsel %vm443_vm7, %v436_v45, 0.0  ;;  %v445_v50 = vsel %vm443_vm7, %v440_v46, 0.0  ;;  %v463_v51 = vsel %vm443_vm7, %v456_v47, 0.0  ;;  %v464_v52 = vsel %vm443_vm7, %v460_v48, 0.0 }
  0xa7   : > { %v446_v1 = vadd.f32 %v445_v50, %v444_v49  ;;  %v465_v53 = vadd.f32 %v464_v52, %v463_v51 }
  0xa9   : > { %447 = vadd.xlane.f32.xlu0 %v446_v1 }
  0xad   : > { %466 = vadd.xlane.f32.xlu0 %v465_v53 }
 0x136   : > { %v448_v0 = vpop.xlane.xlu0 %447 }
 0x137   : > { %450 = vst.msk [vmem:[%s242_s12] sm:$0x1] %vm449_vm8, %v448_v0 }
 0x13a   : > { %v467_v54 = vpop.xlane.xlu0 %466 }
 0x13b   : > { %468 = vst.msk [vmem:[%s245_s0] sm:$0x1] %vm449_vm8, %v467_v54 }
 0x13c PF: > { %s19_s22 = sadd.s32 1, %s741_s22   ;;  %s991_s17 = smov %s725_s18 }
 0x13d   : > { %p16_p11 = scmp.ge.s32.totalorder %s19_s22, 4   ;;  %s992_s18 = smov %s729_s19 }
 0x13e   : > { %s993_s19 = smov %s826_s28  ;;  %s994_s20 = smov %s737_s21 }
 0x13f   : > { %s995_s21 = smov %s997_s23  ;;  %18 = sbr.rel (!%p16_p11) target bundleno = 6 (0x6), region = 99 }
 0x146   :  { %498 = vsyncpa [#allocation7], 1 }
 0x147   :  { %500 = vsyncpa [#allocation7 + $0x1], 1 }

</bundles_post_ra>
